<compile_context>
chip_gen: v7x
topology: tpu7x:2x2x1
jax: 0.10.0
libtpu: 0.0.40
codegen_flags: <defaults>
</compile_context>

<pallas_src>
import jax
import jax.numpy as jnp
from jax.experimental import pallas as pl
from jax.experimental.pallas import tpu as pltpu


def _pick_tile_b(B: int, in_dim: int, hidden: int) -> int:
    """Choose a batch tile: ~512 KiB of state per step, VMEM-budgeted."""
    # Per-row VMEM footprint: double-buffered f32 x tile, f32 hidden-layer
    # temporaries (h / relu(h)), and the lane-padded (tile, 1) f32 output
    # double buffer (a width-1 block pads to 128 lanes -> 512 B/row/buffer).
    bytes_per_row = (2 * 4 * in_dim      # x double buffer (f32)
                     + 2 * 4 * hidden    # hidden-layer f32 temporaries
                     + 2 * 512)          # (tile, 1) f32 out block, lane-padded
    vmem_budget = 20 * 1024 * 1024       # keeps 2-deep pipelining on v7x too
    dma_target = 512 * 1024              # ~512 KiB of state per grid step
    tile = min(vmem_budget // bytes_per_row,
               max(1, dma_target // (4 * in_dim)),
               8192)
    tile = max(128, (tile // 128) * 128)
    # Keep >= ~4 grid steps for large batches so the "parallel" grid axis
    # actually spans both v7x TensorCores (no-op on single-TC v5e/v6e).
    if B >= 4 * 128:
        quarter = ((B + 3) // 4 // 128) * 128
        tile = min(tile, max(128, quarter))
    return tile


def _legalize_tile(tile_b: int, B: int) -> int:
    """Make tile_b legal for the sublane axis: full extent, or a multiple of 8."""
    if tile_b >= B:
        return B                      # single step; block == full array extent
    return max(8, (tile_b // 8) * 8)  # < B and divisible by 8


def critic_kernel(x_ref, w1t_ref, b1_ref, w2_ref, b2_ref, out_ref):
    # x_ref  : (tile_b, in_dim)  f32  VMEM   (natural row-major batch tile)
    # w1t_ref: (in_dim, hidden)  f32  VMEM   (hidden1.weight^T, pinned)
    # b1_ref : (1, hidden)       f32  VMEM   (pinned)
    # w2_ref : (1, hidden)       f32  VMEM   (out.weight row, pinned)
    # b2_ref : (1, 1)            f32  SMEM   scalar
    # out_ref: (tile_b, 1)       f32  VMEM

    # Hidden layer on the MXU (f32 operands, f32 accumulation).
    h = jnp.dot(x_ref[...], w1t_ref[...], preferred_element_type=jnp.float32)
    h = jnp.maximum(h + b1_ref[...], 0.0)        # bias (lane-broadcast) + ReLU, VPU

    # 128 -> 1 head: VPU multiply, then a cross-lane reduction (hidden is the
    # lane axis here) which runs on the XLU slot, off the VALU critical path.
    v = jnp.sum(h * w2_ref[...], axis=1, keepdims=True)   # (tile_b, 1)
    out_ref[...] = v + b2_ref[0, 0]


def critic_forward(state, w1, b1, w2, b2, *, tile_b: int | None = None):
    """Critic forward pass.

    state: (B, in_dim) f32
    w1:    (hidden, in_dim) f32   (hidden1.weight, PyTorch layout)
    b1:    (hidden,)        f32
    w2:    (1, hidden)      f32   (out.weight, PyTorch layout)
    b2:    (1,)             f32
    returns value: (B, 1) f32
    """
    B, in_dim = state.shape
    hidden = w1.shape[0]
    assert w1.shape == (hidden, in_dim)

    if tile_b is None:
        tile_b = _pick_tile_b(B, in_dim, hidden)
    tile_b = _legalize_tile(int(tile_b), B)

    # Tiny one-time weight re-layouts (a few KiB of HBM; negligible).
    x = jnp.asarray(state, jnp.float32)                         # (B, in_dim), untouched
    w1t = jnp.asarray(w1, jnp.float32).T                        # (in_dim, hidden)
    b1_row = jnp.asarray(b1, jnp.float32).reshape(1, hidden)    # (1, hidden)
    w2_row = jnp.asarray(w2, jnp.float32).reshape(1, hidden)    # (1, hidden)
    b2_s = jnp.asarray(b2, jnp.float32).reshape(1, 1)           # SMEM scalar

    grid = (pl.cdiv(B, tile_b),)   # ceil-divide: boundary block is clipped, no padding

    out = pl.pallas_call(
        critic_kernel,
        out_shape=jax.ShapeDtypeStruct((B, 1), jnp.float32),
        grid=grid,
        in_specs=[
            pl.BlockSpec((tile_b, in_dim), lambda i: (i, 0)),       # state: batch-tiled
            pl.BlockSpec((in_dim, hidden), lambda i: (0, 0)),       # W1^T: pinned
            pl.BlockSpec((1, hidden), lambda i: (0, 0)),            # b1: pinned
            pl.BlockSpec((1, hidden), lambda i: (0, 0)),            # w2: pinned
            pl.BlockSpec(memory_space=pltpu.MemorySpace.SMEM),      # b2: SMEM scalar
        ],
        out_specs=pl.BlockSpec((tile_b, 1), lambda i: (i, 0)),
        compiler_params=pltpu.CompilerParams(
            dimension_semantics=("parallel",),
            vmem_limit_bytes=32 * 1024 * 1024,
        ),
    )(x, w1t, b1_row, w2_row, b2_s)

    return out


def init_critic_params(key, in_dim, hidden=128, init_w=0.003):
    """Synthetic init mirroring the PyTorch module's shapes/ranges.

    hidden1: PyTorch default Linear init -> U(-1/sqrt(in_dim), 1/sqrt(in_dim))
    out:     initialize_uniformly        -> U(-init_w, init_w)
    Weights kept in PyTorch layout: w1 (hidden, in_dim), w2 (1, hidden).
    """
    k1, k2, k3, k4 = jax.random.split(key, 4)
    bound1 = 1.0 / jnp.sqrt(float(in_dim))
    w1 = jax.random.uniform(k1, (hidden, in_dim), jnp.float32, -bound1, bound1)
    b1 = jax.random.uniform(k2, (hidden,), jnp.float32, -bound1, bound1)
    w2 = jax.random.uniform(k3, (1, hidden), jnp.float32, -init_w, init_w)
    b2 = jax.random.uniform(k4, (1,), jnp.float32, -init_w, init_w)
    return w1, b1, w2, b2


def _reference(state, w1, b1, w2, b2):
    h = jnp.maximum(
        jnp.dot(state, w1.T, precision=jax.lax.Precision.HIGHEST) + b1[None, :], 0.0)
    return jnp.dot(h, w2.T, precision=jax.lax.Precision.HIGHEST) + b2[None, :]


if __name__ == "__main__":
    key = jax.random.PRNGKey(0)
    in_dim, hidden = 16, 128
    k_x, k_p, k_x2 = jax.random.split(key, 3)
    w1, b1, w2, b2 = init_critic_params(k_p, in_dim, hidden)

    # Case 1: tiny batch (single grid step, block == full extent).
    B1 = 8
    state1 = jax.random.normal(k_x, (B1, in_dim), jnp.float32)
    val1 = jax.block_until_ready(critic_forward(state1, w1, b1, w2, b2))
    ref1 = _reference(state1, w1, b1, w2, b2)
    assert val1.shape == (B1, 1)
    assert jnp.allclose(val1, ref1, atol=1e-4, rtol=1e-4), (
        float(jnp.max(jnp.abs(val1 - ref1))))

    # Case 2: multi-step grid with a partial (clipped) last block, no padding.
    B2 = 260
    state2 = jax.random.normal(k_x2, (B2, in_dim), jnp.float32)
    val2 = jax.block_until_ready(critic_forward(state2, w1, b1, w2, b2, tile_b=128))
    ref2 = _reference(state2, w1, b1, w2, b2)
    assert val2.shape == (B2, 1)
    assert jnp.allclose(val2, ref2, atol=1e-4, rtol=1e-4), (
        float(jnp.max(jnp.abs(val2 - ref2))))

    print("KERNEL_OK")
</pallas_src>

<mosaic_0001>
module attributes {stable_mosaic.version = 11 : i64} {
  func.func @critic_kernel(%arg0: i32, %arg1: memref<8x16xf32, #tpu.memory_space<vmem>>, %arg2: memref<16x128xf32, #tpu.memory_space<vmem>>, %arg3: memref<1x128xf32, #tpu.memory_space<vmem>>, %arg4: memref<1x128xf32, #tpu.memory_space<vmem>>, %arg5: memref<1x1xf32, #tpu.memory_space<smem>>, %arg6: memref<8x1xf32, #tpu.memory_space<vmem>>) attributes {dimension_semantics = [#tpu.dimension_semantics<parallel>], iteration_bounds = array<i64: 1>, scalar_prefetch = 0 : i64, scratch_operands = 0 : i64, tpu.core_type = #tpu.core_type<tc>, window_params = [{transform_indices = @transform_0, window_bounds = array<i64: 8, 16>}, {pipeline_mode = #tpu.pipeline_mode<synchronous>, transform_indices = @transform_1, window_bounds = array<i64: 16, 128>}, {pipeline_mode = #tpu.pipeline_mode<synchronous>, transform_indices = @transform_2, window_bounds = array<i64: 1, 128>}, {pipeline_mode = #tpu.pipeline_mode<synchronous>, transform_indices = @transform_3, window_bounds = array<i64: 1, 128>}, {transform_indices = @transform_4, window_bounds = array<i64: 1, 1>}, {transform_indices = @transform_5, window_bounds = array<i64: 8, 1>}]} {
    %c0 = arith.constant 0 : index
    %c0_0 = arith.constant 0 : index
    %0 = vector.load %arg1[%c0, %c0_0] : memref<8x16xf32, #tpu.memory_space<vmem>>, vector<8x16xf32>
    %c0_1 = arith.constant 0 : index
    %c0_2 = arith.constant 0 : index
    %1 = vector.load %arg2[%c0_1, %c0_2] : memref<16x128xf32, #tpu.memory_space<vmem>>, vector<16x128xf32>
    %cst = arith.constant dense<0.000000e+00> : vector<8x128xf32>
    %2 = tpu.matmul %0, %1, %cst {dimension_numbers = #tpu.dot_dimension_numbers<[1], [0], [0], [1], [0, 0, 1, 1], [], []>} : vector<8x16xf32>, vector<16x128xf32>, vector<8x128xf32> -> vector<8x128xf32>
    %c0_3 = arith.constant 0 : index
    %c0_4 = arith.constant 0 : index
    %3 = vector.load %arg3[%c0_3, %c0_4] : memref<1x128xf32, #tpu.memory_space<vmem>>, vector<1x128xf32>
    %4 = vector.broadcast %3 : vector<1x128xf32> to vector<8x128xf32>
    %5 = arith.addf %2, %4 : vector<8x128xf32>
    %cst_5 = arith.constant 0.000000e+00 : f32
    %6 = vector.broadcast %cst_5 : f32 to vector<8x128xf32>
    %7 = arith.maximumf %5, %6 : vector<8x128xf32>
    %c0_6 = arith.constant 0 : index
    %c0_7 = arith.constant 0 : index
    %8 = vector.load %arg4[%c0_6, %c0_7] : memref<1x128xf32, #tpu.memory_space<vmem>>, vector<1x128xf32>
    %9 = vector.broadcast %8 : vector<1x128xf32> to vector<8x128xf32>
    %10 = arith.mulf %7, %9 : vector<8x128xf32>
    %cst_8 = arith.constant dense<0.000000e+00> : vector<8xf32>
    %11 = vector.multi_reduction <add>, %10, %cst_8 [1] : vector<8x128xf32> to vector<8xf32>
    %12 = vector.shape_cast %11 : vector<8xf32> to vector<8x1xf32>
    %c0_9 = arith.constant 0 : index
    %c0_10 = arith.constant 0 : index
    %13 = memref.load %arg5[%c0_9, %c0_10] : memref<1x1xf32, #tpu.memory_space<smem>>
    %14 = vector.broadcast %13 : f32 to vector<8x1xf32>
    %15 = arith.addf %12, %14 : vector<8x1xf32>
    %c0_11 = arith.constant 0 : index
    %c0_12 = arith.constant 0 : index
    %16 = vector.load %arg6[%c0_11, %c0_12] : memref<8x1xf32, #tpu.memory_space<vmem>>, vector<8x1xf32>
    tpu.vector_store %arg6[%c0_11, %c0_12], %15 {strides = array<i32>} : memref<8x1xf32, #tpu.memory_space<vmem>>, vector<8x1xf32>,
    return
  }
  func.func @transform_0(%arg0: i32) -> (i32, i32) {
    %c0_i32 = arith.constant 0 : i32
    %c0_i32_0 = arith.constant 0 : i32
    return %arg0, %c0_i32 : i32, i32
  }
  func.func @transform_1(%arg0: i32) -> (i32, i32) {
    %c0_i32 = arith.constant 0 : i32
    %c0_i32_0 = arith.constant 0 : i32
    %c0_i32_1 = arith.constant 0 : i32
    return %c0_i32, %c0_i32_0 : i32, i32
  }
  func.func @transform_2(%arg0: i32) -> (i32, i32) {
    %c0_i32 = arith.constant 0 : i32
    %c0_i32_0 = arith.constant 0 : i32
    %c0_i32_1 = arith.constant 0 : i32
    return %c0_i32, %c0_i32_0 : i32, i32
  }
  func.func @transform_3(%arg0: i32) -> (i32, i32) {
    %c0_i32 = arith.constant 0 : i32
    %c0_i32_0 = arith.constant 0 : i32
    %c0_i32_1 = arith.constant 0 : i32
    return %c0_i32, %c0_i32_0 : i32, i32
  }
  func.func @transform_4(%arg0: i32) -> (i32, i32) {
    %c0_i32 = arith.constant 0 : i32
    %c0_i32_0 = arith.constant 0 : i32
    %c0_i32_1 = arith.constant 0 : i32
    return %c0_i32, %c0_i32_0 : i32, i32
  }
  func.func @transform_5(%arg0: i32) -> (i32, i32) {
    %c0_i32 = arith.constant 0 : i32
    %c0_i32_0 = arith.constant 0 : i32
    return %arg0, %c0_i32 : i32, i32
  }
}

</mosaic_0001>

<bundles_post_ra>
// kernel: tpu_custom_call.1
= control target key start
LH: loop header
LB: loop body
LE: loop exit
PB: predicated region body
PF: predicated region fallthrough
CT: control target
= control target key end

     0   :  { %11 = vsyncpa [#allocation4], 0  ;;  %s304_s0 = inlined_call_operand.hbm [shape: f32[8,16], index: 0, kind: input, shape index: {}]   ;;  %s305_s1 = inlined_call_operand.hbm [shape: f32[16,128], index: 1, kind: input, shape index: {}]   ;;  %s306_s2 = inlined_call_operand.vmem [shape: f32[1,128], index: 2, kind: input, shape index: {}]   ;;  %s307_s3 = inlined_call_operand.vmem [shape: f32[1,128], index: 3, kind: input, shape index: {}]   ;;  %s308_s4 = inlined_call_operand.<no memory space> [shape: f32[1,1], index: 4, kind: input, shape index: {}]   ;;  %s309_s5 = inlined_call_operand.vmem [shape: f32[8,1], index: 5, kind: output, shape index: {}]  }
   0x1   :  { %12 = vsyncpa [#allocation6], 0  ;;  %s224_s18 = smov [#allocation3]   ;;  %s225_s20 = smov [#allocation5]  }
   0x2   :  { %s19_s19 = sshll.u32 %s224_s18, 4  ;;  %s28_s21 = sshll.u32 %s225_s20, 4  ;;  %s20_s19 = int_to_ptr.vmem [resolvable:$true] %s19_s19  ;;  %s261_s21 = int_to_ptr.vmem [resolvable:$true] %s28_s21 }
   0x3   :  { %s176_s24 = scalar_lea.hbm %s304_s0, 128 }
   0x4   :  { %p177_p0 = scmp.ne.s32.totalorder %s304_s0, %s176_s24  ;;  %p180_p1 = scmp.lt.u32.totalorder %s176_s24, %s304_s0 }
   0x6   :  { %p182_p2 = pnand %p180_p1, %p177_p0 }
   0x8   :  { %185 = shalt.err (!%p182_p2)
}
   0x9   :  { %s186_s29 = scalar_lea.vmem %s20_s19, 128  ;;  %p191_p4 = scmp.lt.s32.totalorder %s20_s19, %s20_s19 }
   0xa   :  { %p187_p3 = scmp.ne.s32.totalorder %s20_s19, %s186_s29  ;;  %p192_p5 = scmp.lt.s32.totalorder %s186_s29, %s186_s29 }
   0xc   :  { %p193_p6 = por %p192_p5, %p191_p4 }
   0xe   :  { %p194_p7 = pnand %p193_p6, %p187_p3 }
  0x10   :  { %197 = shalt.err (!%p194_p7)
}
  0x11   :  { %22 = dma.hbm_to_vmem [thread:$0]  %s304_s0, 128, %s20_s19, [#allocation4]  }
  0x12   :  { %s198_s9 = scalar_lea.hbm %s305_s1, 256 }
  0x13   :  { %p199_p8 = scmp.ne.s32.totalorder %s305_s1, %s198_s9  ;;  %p202_p9 = scmp.lt.u32.totalorder %s198_s9, %s305_s1 }
  0x15   :  { %p204_p10 = pnand %p202_p9, %p199_p8 }
  0x17   :  { %207 = shalt.err (!%p204_p10)
}
  0x18   :  { %s208_s14 = scalar_lea.vmem %s261_s21, 256  ;;  %p213_p12 = scmp.lt.s32.totalorder %s261_s21, %s261_s21 }
  0x19   :  { %p209_p11 = scmp.ne.s32.totalorder %s261_s21, %s208_s14  ;;  %p214_p13 = scmp.lt.s32.totalorder %s208_s14, %s208_s14 }
  0x1b   :  { %p215_p0 = por %p214_p13, %p213_p12 }
  0x1d   :  { %p216_p1 = pnand %p215_p0, %p209_p11 }
  0x1f   :  { %219 = shalt.err (!%p216_p1)
}
  0x20   :  { %s226_s0 = smov 128   ;;  %s227_s15 = smov 8  }
  0x21   :  { %34 = dma.hbm_to_vmem [thread:$0]  %s305_s1, 256, %s261_s21, [#allocation6], %s226_s0, %s226_s0, %s227_s15  }
  0x22   :  { %220 = dma.done.wait [#allocation4], 128  }
  0x23   :  { %221 = vsyncadd [#allocation4], 4294967168 }
  0x24   :  { %222 = dma.done.wait [#allocation6], 256  }
  0x25   :  { %223 = vsyncadd [#allocation6], 4294967040  ;;  %v228_v0 = vmov 0.0|0.0   ;;  %vm229_vm0 = vmmov 0   ;;  %v230_v1 = vmov 0.0   ;;  %v48_v2 = vld [vmem:[#allocation5] sm:$0xff]  ;;  %v143_v13 = vstv %s308_s4 }
  0x26   :  { %166 = vmatprep.subr.bf16.mxu0 %v228_v0  ;;  %163 = vmatprep.mubr.msk.f32.mxu0 %vm229_vm0, %v230_v1  ;;  %v49_v3 = vld [vmem:[#allocation5 + $0x8] sm:$0xff]  ;;  %v47_v5 = vld [vmem:[#allocation3] sm:$0xff]  ;;  %vm57_vm1 = vcmask 130048   ;;  %vm145_vm2 = vcmask 7168  }
  0x27   :  { %v167_v4 = vpack.c.bf16 %v49_v3, %v48_v2  ;;  %v153_v6 = vld [vmem:[%s306_s2] ss:$0 sm:$0xff] }
  0x28   :  { %v155_v10 = vld [vmem:[%s307_s3] ss:$0 sm:$0xff] }
  0x29   :  { %168 = vmatpush3.bf16.msra.mxu0 %v167_v4 }
  0x2c   :  { %164 = vmatmul.mubr.msk.f32.vlgmr.msra.gmra.mrb[0].mxu0 %vm57_vm1, %v47_v5 }
  0xff   :  { %v127_v7 = vpop.f32.mrb[0].mxu0 }
 0x100   :  { %v128_v8 = vadd.f32 %v153_v6, %v127_v7  ;;  %v165_v9 = vpop.f32.mrb[1].mxu0 }
 0x102   :  { %v131_v11 = vmax.f32 %v128_v8, 0.0 }
 0x104   :  { %v139_v12 = vmul.f32 %v155_v10, %v131_v11 }
 0x106   :  { %140 = vadd.xlane.f32.xlu0 %v139_v12 }
 0x193   :  { %v141_v14 = vpop.xlane.xlu0 %140 }
 0x194   :  { %v144_v15 = vadd.f32 %v143_v13, %v141_v14 }
 0x196   :  { %146 = vst.msk [vmem:[%s309_s5] sm:$0xff] %vm145_vm2, %v144_v15 }
 0x197   :  { %151 = vsyncpa [#allocation4], 1 }
 0x198   :  { %152 = vsyncpa [#allocation6], 1 }

</bundles_post_ra>
